<compile_context>
chip_gen: v6e
topology: v6e:2x2x1
jax: 0.10.0
libtpu: 0.0.40
codegen_flags: <defaults>
</compile_context>

<pallas_src>
import jax
import jax.numpy as jnp
from jax.experimental import pallas as pl
from jax.experimental.pallas import tpu as pltpu


def _se_rgb_kernel(x_ref, g_ref, o_ref):
    # x_ref: (TR, TC) tile of the flattened feature map
    # g_ref: (TR, 1)  per-(b,c) gating logits
    gate = jax.nn.sigmoid(jnp.maximum(g_ref[...].astype(jnp.float32), 0.0))
    o_ref[...] = (x_ref[...] * gate).astype(o_ref.dtype)  # broadcast over lanes


def _pick_tiles(bc, hw, dtype):
    """Pick ~2 MiB lane-dense blocks aligned to dtype sublane packing."""
    itemsize = jnp.dtype(dtype).itemsize
    sub = max(8, 32 // itemsize)          # sublane pack: 8 f32, 16 bf16, 32 int8
    max_col = 8192                        # lane cap (multiple of 128)
    col_tile = hw if hw <= max_col else max_col

    target_bytes = 2 * 1024 * 1024        # ~2 MiB/block: double-buffered in+out
    row_budget = max(sub, target_bytes // (col_tile * itemsize))
    if bc <= row_budget:
        row_tile = bc                     # full extent — always a legal block dim
    else:
        row_tile = max(sub, (row_budget // sub) * sub)
    return row_tile, col_tile


def se_layer_rgb(x0, x1):
    """x0: (b, c, h, w) NCHW features; x1: (b, c) gating logits."""
    b, c, h, w = x0.shape
    bc, hw = b * c, h * w
    itemsize = jnp.dtype(x0.dtype).itemsize

    x_flat = x0.reshape(bc, hw)                       # contiguous, free reshape
    g_flat = x1.reshape(bc, 1).astype(jnp.float32)

    row_tile, col_tile = _pick_tiles(bc, hw, x0.dtype)
    grid = (pl.cdiv(bc, row_tile), pl.cdiv(hw, col_tile))

    cost = pl.CostEstimate(
        flops=2 * bc * hw,                # relu compare + broadcast multiply
        transcendentals=bc,               # one sigmoid per (b, c)
        bytes_accessed=2 * bc * hw * itemsize + bc * 4,
    )

    out_flat = pl.pallas_call(
        _se_rgb_kernel,
        out_shape=jax.ShapeDtypeStruct((bc, hw), x0.dtype),
        grid_spec=pltpu.PrefetchScalarGridSpec(
            num_scalar_prefetch=0,
            grid=grid,
            in_specs=[
                pl.BlockSpec((row_tile, col_tile), lambda i, j: (i, j)),
                # gate block index is constant over j (inner axis) -> DMA'd
                # only when the row block changes.
                pl.BlockSpec((row_tile, 1), lambda i, j: (i, 0)),
            ],
            out_specs=pl.BlockSpec((row_tile, col_tile), lambda i, j: (i, j)),
        ),
        compiler_params=pltpu.CompilerParams(
            dimension_semantics=("parallel", "parallel"),
            vmem_limit_bytes=32 * 1024 * 1024,
        ),
        cost_estimate=cost,
    )(x_flat, g_flat)

    return out_flat.reshape(b, c, h, w)


def _reference(x0, x1):
    y = jax.nn.sigmoid(jnp.maximum(x1, 0.0)).reshape(
        x0.shape[0], x0.shape[1], 1, 1
    )
    return x0 * y


if __name__ == "__main__":
    key = jax.random.PRNGKey(0)
    k0, k1 = jax.random.split(key)

    b, c, h, w = 2, 4, 16, 16
    x0 = jax.random.normal(k0, (b, c, h, w), dtype=jnp.float32)
    x1 = jax.random.normal(k1, (b, c), dtype=jnp.float32)

    out = se_layer_rgb(x0, x1)
    jax.block_until_ready(out)

    ref = _reference(x0, x1)
    assert out.shape == (b, c, h, w)
    assert jnp.allclose(out, ref, atol=1e-5, rtol=1e-5)

    print("KERNEL_OK")
</pallas_src>

<mosaic_0001>
module attributes {stable_mosaic.version = 11 : i64} {
  func.func @_se_rgb_kernel(%arg0: i32, %arg1: i32, %arg2: memref<8x256xf32, #tpu.memory_space<vmem>>, %arg3: memref<8x1xf32, #tpu.memory_space<vmem>>, %arg4: memref<8x256xf32, #tpu.memory_space<vmem>>) attributes {dimension_semantics = [#tpu.dimension_semantics<parallel>, #tpu.dimension_semantics<parallel>], iteration_bounds = array<i64: 1, 1>, scalar_prefetch = 0 : i64, scratch_operands = 0 : i64, tpu.core_type = #tpu.core_type<tc>, window_params = [{transform_indices = @transform_0, window_bounds = array<i64: 8, 256>}, {transform_indices = @transform_1, window_bounds = array<i64: 8, 1>}, {transform_indices = @transform_2, window_bounds = array<i64: 8, 256>}]} {
    %c0 = arith.constant 0 : index
    %c0_0 = arith.constant 0 : index
    %0 = vector.load %arg3[%c0, %c0_0] : memref<8x1xf32, #tpu.memory_space<vmem>>, vector<8x1xf32>
    %cst = arith.constant 0.000000e+00 : f32
    %1 = vector.broadcast %cst : f32 to vector<8x1xf32>
    %2 = arith.maximumf %0, %1 : vector<8x1xf32>
    %3 = arith.negf %2 : vector<8x1xf32>
    %4 = math.exp %3 : vector<8x1xf32>
    %cst_1 = arith.constant 1.000000e+00 : f32
    %5 = vector.broadcast %cst_1 : f32 to vector<8x1xf32>
    %6 = arith.addf %5, %4 : vector<8x1xf32>
    %7 = arith.divf %5, %6 : vector<8x1xf32>
    %c0_2 = arith.constant 0 : index
    %c0_3 = arith.constant 0 : index
    %8 = vector.load %arg2[%c0_2, %c0_3] : memref<8x256xf32, #tpu.memory_space<vmem>>, vector<8x256xf32>
    %9 = vector.broadcast %7 : vector<8x1xf32> to vector<8x256xf32>
    %10 = arith.mulf %8, %9 : vector<8x256xf32>
    %c0_4 = arith.constant 0 : index
    %c0_5 = arith.constant 0 : index
    %11 = vector.load %arg4[%c0_4, %c0_5] : memref<8x256xf32, #tpu.memory_space<vmem>>, vector<8x256xf32>
    tpu.vector_store %arg4[%c0_4, %c0_5], %10 {strides = array<i32>} : memref<8x256xf32, #tpu.memory_space<vmem>>, vector<8x256xf32>,
    return
  }
  func.func @transform_0(%arg0: i32, %arg1: i32) -> (i32, i32) {
    %c0_i32 = arith.constant 0 : i32
    return %arg0, %arg1 : i32, i32
  }
  func.func @transform_1(%arg0: i32, %arg1: i32) -> (i32, i32) {
    %c0_i32 = arith.constant 0 : i32
    %c0_i32_0 = arith.constant 0 : i32
    return %arg0, %c0_i32 : i32, i32
  }
  func.func @transform_2(%arg0: i32, %arg1: i32) -> (i32, i32) {
    %c0_i32 = arith.constant 0 : i32
    return %arg0, %arg1 : i32, i32
  }
}

</mosaic_0001>

<bundles_post_ra>
// kernel: tpu_custom_call.1
= control target key start
LH: loop header
LB: loop body
LE: loop exit
PB: predicated region body
PF: predicated region fallthrough
CT: control target
= control target key end

     0   :  { %7 = vsyncpa [#allocation3], 0  ;;  %s138_s0 = inlined_call_operand.hbm [shape: f32[8,256], index: 0, kind: input, shape index: {}]   ;;  %s139_s1 = inlined_call_operand.vmem [shape: f32[8,1], index: 1, kind: input, shape index: {}]   ;;  %s140_s2 = inlined_call_operand.hbm [shape: f32[8,256], index: 2, kind: output, shape index: {}]  }
   0x1   :  { %8 = vsyncpa [#allocation4], 0  ;;  %s111_s9 = smov [#allocation2]  }
   0x2   :  { %s15_s10 = sshll.u32 %s111_s9, 4  ;;  %s16_s10 = int_to_ptr.vmem [resolvable:$true] %s15_s10 }
   0x3   :  { %s75_s11 = scalar_lea.vmem %s16_s10, 256  ;;  %p80_p1 = scmp.lt.s32.totalorder %s16_s10, %s16_s10 }
   0x4   :  { %p76_p0 = scmp.ne.s32.totalorder %s16_s10, %s75_s11  ;;  %p81_p2 = scmp.lt.s32.totalorder %s75_s11, %s75_s11 }
   0x6   :  { %p82_p3 = por %p81_p2, %p80_p1 }
   0x8   :  { %p83_p4 = pnand %p82_p3, %p76_p0 }
   0xa   :  { %86 = shalt.err (!%p83_p4)
}
   0xb   :  { %18 = dma.hbm_to_vmem [thread:$0]  %s138_s0, 256, %s16_s10, [#allocation3]  }
   0xc   :  { %107 = dma.done.wait [#allocation3], 256  }
   0xd   :  { %108 = vsyncadd [#allocation3], 4294967040  ;;  %v112_v0 = vmov 0   ;;  %v24_v1 = vld [vmem:[%s139_s1] sm:$0xff]  ;;  %v33_v8 = vld [vmem:[#allocation2 + $0x8] sm:$0xff]  ;;  %s113_s16 = smov [#allocation5]  }
   0xe   :  { %62 = vset.pattern.permute.xlu0 %v112_v0  ;;  %v25_v2 = vmax.f32 %v24_v1, 0.0  ;;  %v32_v7 = vld [vmem:[#allocation2] sm:$0xff]  ;;  %s49_s0 = sshll.u32 %s113_s16, 4  ;;  %s50_s0 = int_to_ptr.vmem [resolvable:$true] %s49_s0 }
   0xf   :  { %s87_s17 = scalar_lea.vmem %s50_s0, 256  ;;  %p92_p6 = scmp.lt.s32.totalorder %s50_s0, %s50_s0 }
  0x10   :  { %v58_v3 = vmul.f32 -1.442695, %v25_v2  ;;  %p88_p5 = scmp.ne.s32.totalorder %s50_s0, %s87_s17  ;;  %p93_p7 = scmp.lt.s32.totalorder %s87_s17, %s87_s17 }
  0x12   :  { %63 = vpow2.f32 %v58_v3  ;;  %p94_p8 = por %p93_p7, %p92_p6 }
  0x14   :  { %p95_p9 = pnand %p94_p8, %p88_p5 }
  0x1f   :  { %v64_v4 = vpop.eup %63 }
  0x20   :  { %v29_v5 = vadd.f32 1.0, %v64_v4 }
  0x22   :  { %65 = vrcp.f32 %v29_v5 }
  0x2f   :  { %v66_v6 = vpop.eup %65 }
  0x30   :  { %36 = vperm.xlu0 %62, %v66_v6  }
  0xab   :  { %v37_v9 = vpop.permute.xlu0 %36 }
  0xac   :  { %v39_v10 = vmul.f32 %v37_v9, %v32_v7  ;;  %v40_v11 = vmul.f32 %v37_v9, %v33_v8 }
  0xae   :  { %41 = vst [vmem:[#allocation5] sm:$0xff] %v39_v10  ;;  %42 = vst [vmem:[#allocation5 + $0x8] sm:$0xff] %v40_v11 }
  0xaf   :  { %98 = shalt.err (!%p95_p9)
}
  0xb0   :  { %52 = dma.vmem_to_hbm [thread:$0]  %s50_s0, 256, %s140_s2, [#allocation4]  }
  0xb1   :  { %109 = dma.done.wait [#allocation4], 256  }
  0xb2   :  { %110 = vsyncadd [#allocation4], 4294967040 }
  0xb3   :  { %56 = vsyncpa [#allocation3], 1 }
  0xb4   :  { %57 = vsyncpa [#allocation4], 1 }

</bundles_post_ra>
